<compile_context>
chip_gen: v7x
topology: tpu7x:2x2x1
jax: 0.10.0
libtpu: 0.0.40
codegen_flags: <defaults>
</compile_context>

<pallas_src>
import jax
import jax.numpy as jnp
import numpy as np
from jax.experimental import pallas as pl
from jax.experimental.pallas import tpu as pltpu


def _round_up(x, m):
    return (x + m - 1) // m * m


# --------------------------------------------------------------------------
# Pallas kernel: per-(batch, prior-tile) Smooth-L1 / cross-entropy / positive
# count partial sums, accumulated into a per-batch VMEM block across the
# prior-tile grid axis.
#
# Tile layout (lane-dense, priors on lanes):
#   loc_ref    : [1, 8, T]  rows 0-3 = loc_pred, rows 4-7 = loc_target (native dtype)
#   conf_ref   : [1, C, T]  class logits (native dtype)
#   conf_t_ref : [1, 1, T]  int32 targets (padded tail = -1 -> masked out)
#   out_ref    : [1, 8, 128] f32 accumulator for this batch element:
#                sublane 0 = loc_sum, 1 = ce_sum, 2 = num_pos (all lanes equal)
# --------------------------------------------------------------------------
def _focal_sums_kernel(loc_ref, conf_ref, conf_t_ref, out_ref):
    p = pl.program_id(1)

    @pl.when(p == 0)
    def _init():
        out_ref[...] = jnp.zeros_like(out_ref)

    conf_t = conf_t_ref[0]                 # [1, T] int32
    pos = conf_t > 0                       # positive priors
    valid = conf_t > -1                    # excludes ignore labels & pad tail

    # ---- localization: Smooth-L1 over positive priors (f32 accumulation) ----
    loc = loc_ref[0].astype(jnp.float32)   # [8, T]: pred rows 0-3, target rows 4-7
    d = loc[:4] - loc[4:]                  # [4, T]
    ad = jnp.abs(d)
    sl1 = jnp.where(ad < 1.0, 0.5 * d * d, ad - 0.5)
    loc_partial = jnp.sum(jnp.where(pos, sl1, 0.0))

    # ---- confidence: summed cross-entropy over valid priors ----
    logits = conf_ref[0].astype(jnp.float32)                     # [C, T]
    mx = jnp.max(logits, axis=0, keepdims=True)                  # [1, T]
    lse = jnp.log(jnp.sum(jnp.exp(logits - mx), axis=0, keepdims=True)) + mx
    cls_ids = jax.lax.broadcasted_iota(jnp.int32, logits.shape, 0)
    # fused one-hot gather: compare + select, no one-hot temporary / multiply
    tgt = jnp.sum(jnp.where(cls_ids == conf_t, logits, 0.0),
                  axis=0, keepdims=True)                         # [1, T]
    ce = lse - tgt
    ce_partial = jnp.sum(jnp.where(valid, ce, 0.0))

    npos_partial = jnp.sum(jnp.where(pos, 1.0, 0.0))

    # Scatter the 3 scalars onto sublane rows 0/1/2 (broadcast over lanes) and
    # accumulate into the per-batch VMEM block; no SMEM read-modify-write chain.
    sub = jax.lax.broadcasted_iota(jnp.int32, (8, 128), 0)
    partial = jnp.where(sub == 0, loc_partial,
              jnp.where(sub == 1, ce_partial,
              jnp.where(sub == 2, npos_partial, 0.0)))
    out_ref[0] += partial


def _vmem_limit_bytes():
    cap = 64 * 2 ** 20                      # safe default = smallest current gen (v7x)
    try:
        cap = int(pltpu.get_tpu_info().vmem_capacity_bytes)
    except Exception:
        pass
    # never exceed 3/4 of physical VMEM, never request more than 96 MiB
    return int(min(3 * cap // 4, 96 * 2 ** 20))


def _choose_tile(P, C, conf_itemsize, loc_itemsize, vmem_budget, tile_p=None):
    """Pick a prior-tile size (multiple of 128 lanes) that fits the VMEM budget.

    Default: one tile covering the whole padded prior dim (fewest grid steps);
    if that does not fit, split into the fewest equal tiles that do.
    """
    p_full = _round_up(P, 128)
    # double-buffered input blocks + rough f32 softmax temps, per prior lane
    per_prior = 2 * (C * conf_itemsize + 8 * loc_itemsize + 4) + 4 * C * 4
    max_tile = max(128, (vmem_budget // max(per_prior, 1)) // 128 * 128)
    if tile_p is not None:
        return int(min(_round_up(max(int(tile_p), 128), 128), p_full, max_tile))
    if p_full <= max_tile:
        return int(p_full)
    n_tiles = -(-p_full // max_tile)
    return int(_round_up(-(-p_full // n_tiles), 128))


def focal_multibox_loss(loc_data, conf_data, loc_t, conf_t,
                        alpha=0.25, gamma=2, tile_p=None, channel_major=False):
    """Compute (loc_loss, conf_loss).

    channel_major=False: loc_data [B,P,4], conf_data [B,P,C], loc_t [B,P,4], conf_t [B,P]
    channel_major=True : loc_data [B,4,P], conf_data [B,C,P], loc_t [B,4,P], conf_t [B,P]
    Native dtypes are preserved (bf16 welcome); accumulation is f32 in-kernel.
    """
    if channel_major:
        loc_p_l, loc_t_l, conf_l = loc_data, loc_t, conf_data
        B, C, P = conf_l.shape
    else:
        B, P, C = conf_data.shape
        # TODO(synk): have the SSD conf/loc heads emit channel-major [B,C,P]/[B,4,P]
        # directly (natural conv-output layout) or keep these transposes inside the
        # producer's jit; as standalone ops they re-read/write the largest tensor.
        loc_p_l = jnp.transpose(loc_data, (0, 2, 1))     # [B, 4, P]
        loc_t_l = jnp.transpose(loc_t, (0, 2, 1))        # [B, 4, P]
        conf_l = jnp.transpose(conf_data, (0, 2, 1))     # [B, C, P]

    # Pack loc pred + target into one [B, 8, P] input: full-sublane vregs, one DMA.
    loc_pack = jnp.concatenate([loc_p_l, loc_t_l], axis=1)          # [B, 8, P]
    # TODO(synk): conf_t could ship as int16 (widen in-kernel) for a minor DMA saving.
    conf_t_l = conf_t.astype(jnp.int32)[:, None, :]                 # [B, 1, P]

    vmem_limit = _vmem_limit_bytes()
    tile = _choose_tile(P, C, conf_l.dtype.itemsize, loc_pack.dtype.itemsize,
                        vmem_limit // 2, tile_p)
    p_pad = _round_up(P, tile)
    pad = p_pad - P
    if pad:
        loc_pack = jnp.pad(loc_pack, ((0, 0), (0, 0), (0, pad)))
        conf_l = jnp.pad(conf_l, ((0, 0), (0, 0), (0, pad)))
        conf_t_l = jnp.pad(conf_t_l, ((0, 0), (0, 0), (0, pad)),
                           constant_values=-1)                      # pad -> ignored

    grid = (B, p_pad // tile)

    # TODO(synk): if a profile on v7x (large C) shows exposed DMA, add
    # pipeline_mode=pl.Buffered(3) on the conf BlockSpec.
    sums = pl.pallas_call(
        _focal_sums_kernel,
        out_shape=jax.ShapeDtypeStruct((B, 8, 128), jnp.float32),
        grid=grid,
        in_specs=[
            pl.BlockSpec((1, 8, tile), lambda b, p: (b, 0, p)),
            pl.BlockSpec((1, C, tile), lambda b, p: (b, 0, p)),
            pl.BlockSpec((1, 1, tile), lambda b, p: (b, 0, p)),
        ],
        out_specs=pl.BlockSpec((1, 8, 128), lambda b, p: (b, 0, 0)),
        compiler_params=pltpu.CompilerParams(
            # per-batch accumulator blocks -> batch axis can shard across v7x's
            # two TensorCores; prior-tile axis is a reduction (accumulator resident).
            dimension_semantics=("parallel", "arbitrary"),
            vmem_limit_bytes=vmem_limit),
    )(loc_pack, conf_l, conf_t_l)

    # Reduce the B per-batch partials and finalize once (never per tile):
    loc_sum = jnp.sum(sums[:, 0, 0])
    ce_sum = jnp.sum(sums[:, 1, 0])
    num_pos = jnp.sum(sums[:, 2, 0])

    n = jnp.maximum(1.0, num_pos)
    p_t_log = -ce_sum
    p_t = jnp.exp(p_t_log)
    conf_loss = -float(alpha) * ((1.0 - p_t) ** gamma) * p_t_log / n
    loc_loss = loc_sum / n
    return loc_loss, conf_loss


# --------------------------------------------------------------------------
# Plain-JAX glue: SSD "match" (jaccard overlap + target encoding).
# Kept outside the kernel — data-dependent argmax/gather/scatter, mirrors the
# original per-image CPU loop (now vmapped over the batch).
# --------------------------------------------------------------------------
def _point_form(boxes):
    return jnp.concatenate([boxes[:, :2] - boxes[:, 2:] / 2,
                            boxes[:, :2] + boxes[:, 2:] / 2], axis=1)


def _jaccard(box_a, box_b):
    max_xy = jnp.minimum(box_a[:, None, 2:], box_b[None, :, 2:])
    min_xy = jnp.maximum(box_a[:, None, :2], box_b[None, :, :2])
    wh = jnp.clip(max_xy - min_xy, 0.0)
    inter = wh[..., 0] * wh[..., 1]
    area_a = ((box_a[:, 2] - box_a[:, 0]) * (box_a[:, 3] - box_a[:, 1]))[:, None]
    area_b = ((box_b[:, 2] - box_b[:, 0]) * (box_b[:, 3] - box_b[:, 1]))[None, :]
    return inter / (area_a + area_b - inter)


def _encode(matched, priors, variances):
    g_cxcy = (matched[:, :2] + matched[:, 2:]) / 2 - priors[:, :2]
    g_cxcy = g_cxcy / (variances[0] * priors[:, 2:])
    g_wh = (matched[:, 2:] - matched[:, :2]) / priors[:, 2:]
    g_wh = jnp.log(g_wh) / variances[1]
    return jnp.concatenate([g_cxcy, g_wh], axis=1)


def _match(threshold, truths, priors, variances, labels):
    overlaps = _jaccard(truths, _point_form(priors))        # [num_obj, num_priors]
    best_prior_idx = jnp.argmax(overlaps, axis=1)            # [num_obj]
    best_truth_overlap = jnp.max(overlaps, axis=0)            # [num_priors]
    best_truth_idx = jnp.argmax(overlaps, axis=0)             # [num_priors]
    best_truth_overlap = best_truth_overlap.at[best_prior_idx].set(2.0)
    best_truth_idx = best_truth_idx.at[best_prior_idx].set(
        jnp.arange(truths.shape[0], dtype=best_truth_idx.dtype))
    matches = truths[best_truth_idx]
    conf = labels[best_truth_idx].astype(jnp.int32) + 1
    conf = jnp.where(best_truth_overlap < threshold, 0, conf)
    loc = _encode(matches, priors, variances)
    return loc, conf


# --------------------------------------------------------------------------
# Module wrapper mirroring focalLoss.forward
# --------------------------------------------------------------------------
class FocalLoss:
    def __init__(self, num_classes, overlap_thresh, neg_mining, encode_target,
                 gamma=2, alpha=0.25, variance=(0.1, 0.2), tile_p=None):
        self.num_classes = num_classes
        self.threshold = overlap_thresh
        self.do_neg_mining = neg_mining          # unused in forward (as in torch)
        self.encode_target = encode_target       # unused in forward (as in torch)
        self.gamma = gamma
        self.alpha = alpha
        self.variance = variance
        self.tile_p = tile_p

    def forward(self, predictions, priors, targets):
        loc_data, conf_data = predictions
        if isinstance(targets, (list, tuple)):   # fixed num_objs assumed
            targets = jnp.stack(targets, axis=0)
        truths = targets[..., :-1]
        labels = targets[..., -1]
        match_fn = jax.vmap(
            lambda t, l: _match(self.threshold, t, priors, self.variance, l))
        loc_t, conf_t = match_fn(truths, labels)
        return focal_multibox_loss(loc_data, conf_data, loc_t, conf_t,
                                   alpha=self.alpha, gamma=self.gamma,
                                   tile_p=self.tile_p)


# --------------------------------------------------------------------------
# Pure-JAX reference for the loss math (validates the kernel)
# --------------------------------------------------------------------------
def _reference_loss(loc_data, conf_data, loc_t, conf_t, alpha, gamma):
    pos = conf_t > 0
    num_pos = jnp.sum(pos)
    d = loc_data - loc_t
    ad = jnp.abs(d)
    sl1 = jnp.where(ad < 1.0, 0.5 * d * d, ad - 0.5)
    loc_sum = jnp.sum(sl1 * pos[..., None])
    lse = jax.scipy.special.logsumexp(conf_data, axis=-1)
    tgt = jnp.take_along_axis(conf_data, conf_t[..., None], axis=-1)[..., 0]
    ce = lse - tgt
    ce_sum = jnp.sum(jnp.where(conf_t > -1, ce, 0.0))
    n = jnp.maximum(1.0, num_pos.astype(jnp.float32))
    p_t_log = -ce_sum
    p_t = jnp.exp(p_t_log)
    conf_loss = -alpha * ((1.0 - p_t) ** gamma * p_t_log)
    return loc_sum / n, conf_loss / n


if __name__ == "__main__":
    key = jax.random.PRNGKey(0)
    B, P, C, num_objs = 2, 300, 8, 3   # P not a multiple of 128 -> tests padding

    k1, k2, k3, k4, k5, k6, k7 = jax.random.split(key, 7)

    # priors in (cx, cy, w, h) form
    prior_cxy = jax.random.uniform(k1, (P, 2), minval=0.2, maxval=0.8)
    prior_wh = jax.random.uniform(k2, (P, 2), minval=0.1, maxval=0.4)
    priors = jnp.concatenate([prior_cxy, prior_wh], axis=1).astype(jnp.float32)

    # ground-truth boxes in corner form, labels in [0, C-2]
    gt_cxy = jax.random.uniform(k3, (B, num_objs, 2), minval=0.3, maxval=0.7)
    gt_wh = jax.random.uniform(k4, (B, num_objs, 2), minval=0.1, maxval=0.4)
    gt_boxes = jnp.concatenate([gt_cxy - gt_wh / 2, gt_cxy + gt_wh / 2], axis=-1)
    gt_labels = jax.random.randint(k5, (B, num_objs, 1), 0, C - 1).astype(jnp.float32)
    targets = jnp.concatenate([gt_boxes, gt_labels], axis=-1)   # [B, num_objs, 5]

    # network predictions (kept in their native dtype by the wrapper)
    loc_data = jax.random.normal(k6, (B, P, 4), dtype=jnp.float32)
    conf_data = jax.random.normal(k7, (B, P, C), dtype=jnp.float32)

    criterion = FocalLoss(num_classes=C, overlap_thresh=0.5,
                          neg_mining=True, encode_target=False,
                          gamma=2, alpha=0.25, variance=(0.1, 0.2))

    # jit the full forward so the layout plumbing can fuse with the match/encode ops
    loss_fn = jax.jit(lambda ld, cd, pr, tg: criterion.forward((ld, cd), pr, tg))
    loss_l, loss_c = jax.block_until_ready(loss_fn(loc_data, conf_data, priors, targets))

    # ----- validate vs pure-JAX reference (same match glue, loss in Pallas) -----
    loc_t_list, conf_t_list = [], []
    for idx in range(B):
        l_t, c_t = _match(0.5, targets[idx][:, :-1], priors, (0.1, 0.2),
                          targets[idx][:, -1])
        loc_t_list.append(l_t)
        conf_t_list.append(c_t)
    loc_t = jnp.stack(loc_t_list)
    conf_t = jnp.stack(conf_t_list)
    ref_l, ref_c = _reference_loss(loc_data, conf_data, loc_t, conf_t, 0.25, 2)
    np.testing.assert_allclose(np.asarray(loss_l), np.asarray(ref_l),
                               rtol=1e-4, atol=1e-4)
    np.testing.assert_allclose(np.asarray(loss_c), np.asarray(ref_c),
                               rtol=1e-4, atol=1e-4)

    # ----- multi-tile path: grid=(B, 3) with a padded, masked tail -----
    l2, c2 = focal_multibox_loss(loc_data, conf_data, loc_t, conf_t,
                                 alpha=0.25, gamma=2, tile_p=128)
    l2, c2 = jax.block_until_ready((l2, c2))
    np.testing.assert_allclose(np.asarray(l2), np.asarray(ref_l),
                               rtol=1e-4, atol=1e-4)
    np.testing.assert_allclose(np.asarray(c2), np.asarray(ref_c),
                               rtol=1e-4, atol=1e-4)

    # ----- channel-major path (no wrapper transposes, as a producer would emit) -----
    l3, c3 = focal_multibox_loss(jnp.transpose(loc_data, (0, 2, 1)),
                                 jnp.transpose(conf_data, (0, 2, 1)),
                                 jnp.transpose(loc_t, (0, 2, 1)),
                                 conf_t, alpha=0.25, gamma=2, channel_major=True)
    l3, c3 = jax.block_until_ready((l3, c3))
    np.testing.assert_allclose(np.asarray(l3), np.asarray(ref_l),
                               rtol=1e-4, atol=1e-4)
    np.testing.assert_allclose(np.asarray(c3), np.asarray(ref_c),
                               rtol=1e-4, atol=1e-4)

    print("KERNEL_OK")
</pallas_src>

<mosaic_0001>
module attributes {stable_mosaic.version = 11 : i64} {
  func.func @_focal_sums_kernel(%arg0: i32, %arg1: i32, %arg2: memref<1x8x384xf32, #tpu.memory_space<vmem>>, %arg3: memref<1x8x384xf32, #tpu.memory_space<vmem>>, %arg4: memref<1x1x384xi32, #tpu.memory_space<vmem>>, %arg5: memref<1x8x128xf32, #tpu.memory_space<vmem>>) attributes {dimension_semantics = [#tpu.dimension_semantics<parallel>, #tpu.dimension_semantics<arbitrary>], iteration_bounds = array<i64: 2, 1>, scalar_prefetch = 0 : i64, scratch_operands = 0 : i64, tpu.core_type = #tpu.core_type<tc>, window_params = [{transform_indices = @transform_0, window_bounds = array<i64: 1, 8, 384>}, {transform_indices = @transform_1, window_bounds = array<i64: 1, 8, 384>}, {transform_indices = @transform_2, window_bounds = array<i64: 1, 1, 384>}, {transform_indices = @transform_3, window_bounds = array<i64: 1, 8, 128>}]} {
    %c0_i32 = arith.constant 0 : i32
    %0 = arith.cmpi eq, %arg1, %c0_i32 : i32
    %1 = arith.extui %0 : i1 to i32
    %c0_i32_0 = arith.constant 0 : i32
    %2 = arith.cmpi ne, %1, %c0_i32_0 : i32
    scf.if %2 {
      %cst_31 = arith.constant 0.000000e+00 : f32
      %83 = vector.broadcast %cst_31 : f32 to vector<1x8x128xf32>
      %c0_32 = arith.constant 0 : index
      %c0_33 = arith.constant 0 : index
      %c0_34 = arith.constant 0 : index
      %84 = vector.load %arg5[%c0_32, %c0_33, %c0_34] : memref<1x8x128xf32, #tpu.memory_space<vmem>>, vector<1x8x128xf32>
      tpu.vector_store %arg5[%c0_32, %c0_33, %c0_34], %83 {strides = array<i32>} : memref<1x8x128xf32, #tpu.memory_space<vmem>>, vector<1x8x128xf32>,
    } else {
    }
    %c0 = arith.constant 0 : index
    %c0_1 = arith.constant 0 : index
    %c0_2 = arith.constant 0 : index
    %3 = vector.load %arg4[%c0, %c0_1, %c0_2] : memref<1x1x384xi32, #tpu.memory_space<vmem>>, vector<1x1x384xi32>
    %4 = vector.shape_cast %3 : vector<1x1x384xi32> to vector<1x384xi32>
    %c0_i32_3 = arith.constant 0 : i32
    %5 = vector.broadcast %c0_i32_3 : i32 to vector<1x384xi32>
    %6 = arith.cmpi sgt, %4, %5 : vector<1x384xi32>
    %c-1_i32 = arith.constant -1 : i32
    %7 = vector.broadcast %c-1_i32 : i32 to vector<1x384xi32>
    %8 = arith.cmpi sgt, %4, %7 : vector<1x384xi32>
    %c0_4 = arith.constant 0 : index
    %c0_5 = arith.constant 0 : index
    %c0_6 = arith.constant 0 : index
    %9 = vector.load %arg2[%c0_4, %c0_5, %c0_6] : memref<1x8x384xf32, #tpu.memory_space<vmem>>, vector<1x8x384xf32>
    %10 = vector.shape_cast %9 : vector<1x8x384xf32> to vector<8x384xf32>
    %11 = vector.extract_strided_slice %10 {offsets = [0, 0], sizes = [4, 384], strides = [1, 1]} : vector<8x384xf32> to vector<4x384xf32>
    %12 = vector.extract_strided_slice %10 {offsets = [4, 0], sizes = [4, 384], strides = [1, 1]} : vector<8x384xf32> to vector<4x384xf32>
    %13 = arith.subf %11, %12 : vector<4x384xf32>
    %14 = math.absf %13 : vector<4x384xf32>
    %cst = arith.constant 1.000000e+00 : f32
    %15 = vector.broadcast %cst : f32 to vector<4x384xf32>
    %16 = arith.cmpf olt, %14, %15 : vector<4x384xf32>
    %cst_7 = arith.constant 5.000000e-01 : f32
    %17 = vector.broadcast %cst_7 : f32 to vector<4x384xf32>
    %18 = arith.mulf %17, %13 : vector<4x384xf32>
    %19 = arith.mulf %18, %13 : vector<4x384xf32>
    %cst_8 = arith.constant 5.000000e-01 : f32
    %20 = vector.broadcast %cst_8 : f32 to vector<4x384xf32>
    %21 = arith.subf %14, %20 : vector<4x384xf32>
    %22 = arith.select %16, %19, %21 : vector<4x384xi1>, vector<4x384xf32>
    %cst_9 = arith.constant 0.000000e+00 : f32
    %23 = vector.shape_cast %6 : vector<1x384xi1> to vector<1x384xi1>
    %24 = vector.broadcast %23 : vector<1x384xi1> to vector<4x384xi1>
    %25 = vector.broadcast %cst_9 : f32 to vector<4x384xf32>
    %26 = arith.select %24, %22, %25 : vector<4x384xi1>, vector<4x384xf32>
    %27 = vector.shape_cast %26 : vector<4x384xf32> to vector<1x4x384xf32>
    %cst_10 = arith.constant dense<0.000000e+00> : vector<1xf32>
    %28 = vector.multi_reduction <add>, %27, %cst_10 [1, 2] : vector<1x4x384xf32> to vector<1xf32>
    %29 = vector.shape_cast %28 : vector<1xf32> to vector<1x1x1xf32>
    %30 = vector.extract %29[0, 0, 0] : f32 from vector<1x1x1xf32>
    %c0_11 = arith.constant 0 : index
    %c0_12 = arith.constant 0 : index
    %c0_13 = arith.constant 0 : index
    %31 = vector.load %arg3[%c0_11, %c0_12, %c0_13] : memref<1x8x384xf32, #tpu.memory_space<vmem>>, vector<1x8x384xf32>
    %32 = vector.shape_cast %31 : vector<1x8x384xf32> to vector<8x384xf32>
    %cst_14 = arith.constant dense<0xFF800000> : vector<384xf32>
    %33 = vector.multi_reduction <maximumf>, %32, %cst_14 [0] : vector<8x384xf32> to vector<384xf32>
    %34 = vector.shape_cast %33 : vector<384xf32> to vector<1x384xf32>
    %35 = vector.broadcast %34 : vector<1x384xf32> to vector<8x384xf32>
    %36 = arith.subf %32, %35 : vector<8x384xf32>
    %37 = math.exp %36 : vector<8x384xf32>
    %cst_15 = arith.constant dense<0.000000e+00> : vector<384xf32>
    %38 = vector.multi_reduction <add>, %37, %cst_15 [0] : vector<8x384xf32> to vector<384xf32>
    %39 = vector.shape_cast %38 : vector<384xf32> to vector<1x384xf32>
    %40 = math.log %39 : vector<1x384xf32>
    %41 = arith.addf %40, %34 : vector<1x384xf32>
    %42 = tpu.iota {dimensions = array<i32: 0>} : vector<8x384xi32>
    %43 = vector.broadcast %4 : vector<1x384xi32> to vector<8x384xi32>
    %44 = arith.cmpi eq, %42, %43 : vector<8x384xi32>
    %cst_16 = arith.constant 0.000000e+00 : f32
    %45 = vector.broadcast %cst_16 : f32 to vector<8x384xf32>
    %46 = arith.select %44, %32, %45 : vector<8x384xi1>, vector<8x384xf32>
    %cst_17 = arith.constant dense<0.000000e+00> : vector<384xf32>
    %47 = vector.multi_reduction <add>, %46, %cst_17 [0] : vector<8x384xf32> to vector<384xf32>
    %48 = vector.shape_cast %47 : vector<384xf32> to vector<1x384xf32>
    %49 = arith.subf %41, %48 : vector<1x384xf32>
    %cst_18 = arith.constant 0.000000e+00 : f32
    %50 = vector.broadcast %cst_18 : f32 to vector<1x384xf32>
    %51 = arith.select %8, %49, %50 : vector<1x384xi1>, vector<1x384xf32>
    %52 = vector.shape_cast %51 : vector<1x384xf32> to vector<1x1x384xf32>
    %cst_19 = arith.constant dense<0.000000e+00> : vector<1xf32>
    %53 = vector.multi_reduction <add>, %52, %cst_19 [1, 2] : vector<1x1x384xf32> to vector<1xf32>
    %54 = vector.shape_cast %53 : vector<1xf32> to vector<1x1x1xf32>
    %55 = vector.extract %54[0, 0, 0] : f32 from vector<1x1x1xf32>
    %cst_20 = arith.constant 1.000000e+00 : f32
    %cst_21 = arith.constant 0.000000e+00 : f32
    %56 = vector.broadcast %cst_20 : f32 to vector<1x384xf32>
    %57 = vector.broadcast %cst_21 : f32 to vector<1x384xf32>
    %58 = arith.select %6, %56, %57 : vector<1x384xi1>, vector<1x384xf32>
    %59 = vector.shape_cast %58 : vector<1x384xf32> to vector<1x1x384xf32>
    %cst_22 = arith.constant dense<0.000000e+00> : vector<1xf32>
    %60 = vector.multi_reduction <add>, %59, %cst_22 [1, 2] : vector<1x1x384xf32> to vector<1xf32>
    %61 = vector.shape_cast %60 : vector<1xf32> to vector<1x1x1xf32>
    %62 = vector.extract %61[0, 0, 0] : f32 from vector<1x1x1xf32>
    %63 = tpu.iota {dimensions = array<i32: 0>} : vector<8x128xi32>
    %c0_i32_23 = arith.constant 0 : i32
    %64 = vector.broadcast %c0_i32_23 : i32 to vector<8x128xi32>
    %65 = arith.cmpi eq, %63, %64 : vector<8x128xi32>
    %c1_i32 = arith.constant 1 : i32
    %66 = vector.broadcast %c1_i32 : i32 to vector<8x128xi32>
    %67 = arith.cmpi eq, %63, %66 : vector<8x128xi32>
    %c2_i32 = arith.constant 2 : i32
    %68 = vector.broadcast %c2_i32 : i32 to vector<8x128xi32>
    %69 = arith.cmpi eq, %63, %68 : vector<8x128xi32>
    %cst_24 = arith.constant 0.000000e+00 : f32
    %70 = vector.broadcast %62 : f32 to vector<8x128xf32>
    %71 = vector.broadcast %cst_24 : f32 to vector<8x128xf32>
    %72 = arith.select %69, %70, %71 : vector<8x128xi1>, vector<8x128xf32>
    %73 = vector.broadcast %55 : f32 to vector<8x128xf32>
    %74 = arith.select %67, %73, %72 : vector<8x128xi1>, vector<8x128xf32>
    %75 = vector.broadcast %30 : f32 to vector<8x128xf32>
    %76 = arith.select %65, %75, %74 : vector<8x128xi1>, vector<8x128xf32>
    %c0_25 = arith.constant 0 : index
    %c0_26 = arith.constant 0 : index
    %c0_27 = arith.constant 0 : index
    %77 = vector.load %arg5[%c0_25, %c0_26, %c0_27] : memref<1x8x128xf32, #tpu.memory_space<vmem>>, vector<1x8x128xf32>
    %78 = vector.shape_cast %77 : vector<1x8x128xf32> to vector<8x128xf32>
    %79 = arith.addf %78, %76 : vector<8x128xf32>
    %c0_28 = arith.constant 0 : index
    %c0_29 = arith.constant 0 : index
    %c0_30 = arith.constant 0 : index
    %80 = vector.load %arg5[%c0_28, %c0_29, %c0_30] : memref<1x8x128xf32, #tpu.memory_space<vmem>>, vector<1x8x128xf32>
    %81 = vector.shape_cast %80 : vector<1x8x128xf32> to vector<8x128xf32>
    %82 = vector.shape_cast %79 : vector<8x128xf32> to vector<1x8x128xf32>
    tpu.vector_store %arg5[%c0_28, %c0_29, %c0_30], %82 {strides = array<i32>} : memref<1x8x128xf32, #tpu.memory_space<vmem>>, vector<1x8x128xf32>,
    return
  }
  func.func @transform_0(%arg0: i32, %arg1: i32) -> (i32, i32, i32) {
    %c0_i32 = arith.constant 0 : i32
    %c0_i32_0 = arith.constant 0 : i32
    return %arg0, %c0_i32, %arg1 : i32, i32, i32
  }
  func.func @transform_1(%arg0: i32, %arg1: i32) -> (i32, i32, i32) {
    %c0_i32 = arith.constant 0 : i32
    %c0_i32_0 = arith.constant 0 : i32
    return %arg0, %c0_i32, %arg1 : i32, i32, i32
  }
  func.func @transform_2(%arg0: i32, %arg1: i32) -> (i32, i32, i32) {
    %c0_i32 = arith.constant 0 : i32
    %c0_i32_0 = arith.constant 0 : i32
    return %arg0, %c0_i32, %arg1 : i32, i32, i32
  }
  func.func @transform_3(%arg0: i32, %arg1: i32) -> (i32, i32, i32) {
    %c0_i32 = arith.constant 0 : i32
    %c0_i32_0 = arith.constant 0 : i32
    %c0_i32_1 = arith.constant 0 : i32
    return %arg0, %c0_i32, %c0_i32_0 : i32, i32, i32
  }
}

</mosaic_0001>

<bundles_post_ra>
// kernel: _lambda_.1
= control target key start
LH: loop header
LB: loop body
LE: loop exit
PB: predicated region body
PF: predicated region fallthrough
CT: control target
= control target key end

     0   :  { %s748_s12 = smov 0   ;;  %s750_s13 = smov 0   ;;  %s892_s0 = inlined_call_operand.vmem [shape: f32[2,8,384], index: 0, kind: input, shape index: {}]   ;;  %s893_s1 = inlined_call_operand.vmem [shape: f32[2,8,384], index: 1, kind: input, shape index: {}]   ;;  %s894_s2 = inlined_call_operand.vmem [shape: s32[2,1,384], index: 2, kind: input, shape index: {}]   ;;  %s895_s3 = inlined_call_operand.vmem [shape: f32[2,8,128], index: 3, kind: output, shape index: {}]  }
   0x1   :  { %s752_s14 = smov 0  }
   0x2 LB: > { %s25_s15 = sadd.s32 1, %s719_s13  ;;  %p645_p0 = scmp.ge.s32.totalorder %s723_s14, 1  ;;  %s723_s14 = sphi %s752_s14, %s13_s14   ;;  %s719_s13 = sphi %s750_s13, %s905_s13   ;;  %s715_s12 = sphi %s748_s12, %s904_s12  }
   0x3   : > { %p27_p1 = scmp.ge.s32.totalorder %s25_s15, 2  ;;  %p189_p2 = scmp.lt.s32.totalorder %s723_s14, 3 }
   0x5   : > { %s907_s15 = smov (%p27_p1, %s25_s15), 0  ;;  %p190_p3 = pnand %p645_p0, %p189_p2 }
   0x6   : > { %p234_p4 = scmp.lt.s32.totalorder (!%p190_p3), %s715_s12, 1  ;;  %v308_v0 = vlaneseq (!%p190_p3)  ;;  %v725_v15 = vmov (!%p190_p3), 0   ;;  %vm326_vm7 = vcmask (!%p190_p3), 1043456   ;;  %vm483_vm8 = vcmask (!%p190_p3), 1040384  }
   0x7   : > { %193 = sbr.rel (%p190_p3) target bundleno = 312 (0x138), region = 32  ;;  %v726_v51 = vmov (!%p190_p3), 0.0  }
   0x8   : > { %v770_v1 = vshrl.u32 (!%p190_p3), %v308_v0, 7 }
   0xa   : > { %v782_v9 = vsub.s32 (!%p190_p3), 0, %v770_v1  ;;  %v785_v10 = vsub.s32 (!%p190_p3), 1, %v770_v1  ;;  %v788_v11 = vsub.s32 (!%p190_p3), 2, %v770_v1  ;;  %vm531_vm13 = vcmp.eq.s32.totalorder (!%p190_p3), %v770_v1, 2 }
   0xb   : > { %vm530_vm14 = vcmp.eq.s32.totalorder (!%p190_p3), %v770_v1, 1  ;;  %vm529_vm15 = vcmp.eq.s32.totalorder (!%p190_p3), %v770_v1, 0 }
   0xe   : > { %s909_s12 = smov (!%p234_p4, %s715_s12), 1 }
   0xf   : > { %s654_s16 = smul.u32 24, %s909_s12  ;;  %s648_s30 = sshll.u32 %s909_s12, 3 }
  0x10   : > { %s655_s17 = smul.u32 3, %s909_s12  ;;  %s265_s6 = scalar_lea.vmem %s895_s3, %s648_s30 }
  0x11   : > { %s241_s20 = scalar_lea.vmem %s892_s0, %s654_s16  ;;  %s795_s26 = scalar_lea.vmem %s893_s1, %s654_s16 }
  0x12   : > { %s260_s23 = scalar_lea.vmem %s894_s2, %s655_s17  ;;  %v274_v2 = vld [vmem:[%s241_s20] sm:$0xff]  ;;  %v275_v3 = vld [vmem:[%s241_s20 + $0x8] sm:$0xff]  ;;  %v276_v4 = vld [vmem:[%s241_s20 + $0x10] sm:$0xff] }
  0x13   : > { %v778_v5 = vld [vmem:[%s260_s23] sm:$0x7]  ;;  %v280_v6 = vrot.slane %v274_v2, 4  ;;  %v281_v7 = vrot.slane %v275_v3, 4  ;;  %v282_v8 = vrot.slane %v276_v4, 4  ;;  %v820_v32 = vld [vmem:[%s795_s26 + $0x8] sm:$0xff] }
  0x14   : > { %vm272_vm0 = vcmp.gt.s32.totalorder %v778_v5, 0  ;;  %v817_v31 = vld [vmem:[%s795_s26] sm:$0xff]  ;;  %v350_v41 = vrot.slane %v820_v32, 4  ;;  %v343_v50 = vld [vmem:[%s795_s26 + $0x10] sm:$0xff]  ;;  %v407_v26 = vrot.slane %v778_v5, %v785_v10  ;;  %v411_v27 = vrot.slane %v778_v5, %v788_v11 }
  0x15   : > { %v286_v12 = vsub.f32 %v274_v2, %v280_v6  ;;  %v287_v13 = vsub.f32 %v275_v3, %v281_v7  ;;  %v288_v14 = vsub.f32 %v276_v4, %v282_v8  ;;  %v307_v16 = vsel %vm272_vm0, 1, %v725_v15 }
  0x16   : > { %v311_v17 = vrot.slane %v307_v16, %v782_v9  ;;  %v315_v18 = vrot.slane %v307_v16, %v785_v10  ;;  %v319_v22 = vrot.slane %v307_v16, %v788_v11  ;;  %v344_v40 = vrot.slane %v817_v31, 4 }
  0x17   : > { %v289_v19 = vand.u32 2147483647, %v286_v12  ;;  %v290_v20 = vand.u32 2147483647, %v287_v13  ;;  %v291_v21 = vand.u32 2147483647, %v288_v14  ;;  %v351_v54 = vmax.f32 %v820_v32, %v350_v41 }
  0x18   : > { %v295_v23 = vmul.f32 0.5, %v286_v12  ;;  %v296_v24 = vmul.f32 0.5, %v287_v13  ;;  %v297_v25 = vmul.f32 0.5, %v288_v14  ;;  %vm800_vm1 = vcmp.eq.s32.totalorder %v311_v17, 1 }
  0x19   : > { %vm804_vm2 = vcmp.lt.f32.partialorder %v289_v19, 1.0  ;;  %vm808_vm3 = vcmp.lt.f32.partialorder %v290_v20, 1.0  ;;  %vm812_vm4 = vcmp.lt.f32.partialorder %v291_v21, 1.0  ;;  %v649_v30 = vadd.f32 -0.5, %v289_v19 }
  0x1a   : > { %v298_v33 = vmul.f32 %v295_v23, %v286_v12  ;;  %v299_v34 = vmul.f32 %v296_v24, %v287_v13  ;;  %v300_v35 = vmul.f32 %v297_v25, %v288_v14  ;;  %v650_v36 = vadd.f32 -0.5, %v290_v20 }
  0x1b   : > { %v651_v37 = vadd.f32 -0.5, %v291_v21  ;;  %vm321_vm5 = vcmp.eq.s32.totalorder %v315_v18, 1  ;;  %vm322_vm6 = vcmp.eq.s32.totalorder %v319_v22, 1  ;;  %v498_v52 = vsel %vm272_vm0, 1.0, %v726_v51 }
  0x1c   : > { %v304_v38 = vsel %vm804_vm2, %v298_v33, %v649_v30  ;;  %v305_v39 = vsel %vm808_vm3, %v299_v34, %v650_v36  ;;  %v345_v53 = vmax.f32 %v817_v31, %v344_v40  ;;  %v503_v56 = vrot.slane %v498_v52, %v782_v9 }
  0x1d   : > { %v306_v42 = vsel %vm812_vm4, %v300_v35, %v651_v37  ;;  %v323_v43 = vsel %vm800_vm1, %v304_v38, 0.0  ;;  %v324_v44 = vsel %vm321_vm5, %v305_v39, 0.0  ;;  %v507_v57 = vrot.slane %v498_v52, %v785_v10 }
  0x1e   : > { %v325_v45 = vsel %vm322_vm6, %v306_v42, 0.0  ;;  %v327_v46 = vsel %vm326_vm7, %v323_v43, 0.0  ;;  %v328_v47 = vsel %vm326_vm7, %v324_v44, 0.0  ;;  %v511_v58 = vrot.slane %v498_v52, %v788_v11 }
  0x1f   : > { %v329_v48 = vadd.f32 %v328_v47, %v327_v46  ;;  %v330_v49 = vsel %vm326_vm7, %v325_v45, 0.0  ;;  %v346_v59 = vrot.slane %v345_v53, 2  ;;  %v352_v60 = vrot.slane %v351_v54, 2 }
  0x20   : > { %v356_v61 = vrot.slane %v343_v50, 4  ;;  %v515_v62 = vsel %vm483_vm8, %v503_v56, 0.0  ;;  %v516_v63 = vsel %vm483_vm8, %v507_v57, 0.0  ;;  %v518_v0 = vsel %vm483_vm8, %v511_v58, 0.0 }
  0x21   : > { %v331_v55 = vadd.f32 %v330_v49, %v329_v48  ;;  %v517_v2 = vadd.f32 %v516_v63, %v515_v62  ;;  %v347_v3 = vmax.f32 %v345_v53, %v346_v59  ;;  %v353_v4 = vmax.f32 %v351_v54, %v352_v60 }
  0x22   : > { %v357_v6 = vmax.f32 %v343_v50, %v356_v61  ;;  %v403_v25 = vrot.slane %v778_v5, %v782_v9  ;;  %vm413_vm10 = vcmp.eq.s32.totalorder %v770_v1, %v407_v26  ;;  %vm414_vm11 = vcmp.eq.s32.totalorder %v770_v1, %v411_v27 }
  0x23   : > { %332 = vadd.xlane.f32.xlu0 %v331_v55  ;;  %v519_v7 = vadd.f32 %v518_v0, %v517_v2  ;;  %v348_v8 = vrot.slane %v347_v3, 1  ;;  %v354_v12 = vrot.slane %v353_v4, 1  ;;  %v416_v34 = vsel %vm413_vm10, %v820_v32, 0.0 }
  0x24   : > { %v358_v13 = vrot.slane %v357_v6, 2  ;;  %vm412_vm9 = vcmp.eq.s32.totalorder %v770_v1, %v403_v25  ;;  %v424_v40 = vrot.slane %v416_v34, 4  ;;  %v417_v43 = vsel %vm414_vm11, %v343_v50, 0.0 }
  0x25   : > { %520 = vadd.xlane.f32.xlu1 %v519_v7  ;;  %v843_v14 = vmax.f32 %v347_v3, %v348_v8  ;;  %v845_v15 = vmax.f32 %v353_v4, %v354_v12  ;;  %v415_v30 = vsel %vm412_vm9, %v817_v31, 0.0  ;;  %v727_v3 = vmov 1966171168  }
  0x26   : > { %v359_v16 = vmax.f32 %v357_v6, %v358_v13  ;;  %v418_v38 = vrot.slane %v415_v30, 4  ;;  %v425_v52 = vadd.f32 %v424_v40, %v416_v34  ;;  %v444_v4 = vunpack.c.l.s4 %v727_v3 }
  0x27   : > { %v362_v18 = vsub.f32 %v817_v31, %v843_v14  ;;  %v363_v19 = vsub.f32 %v820_v32, %v845_v15  ;;  %v430_v31 = vrot.slane %v417_v43, 4  ;;  %vm273_vm12 = vcmp.gt.s32.totalorder %v778_v5, 4294967295 }
  0x28   : > { %v360_v17 = vrot.slane %v359_v16, 1  ;;  %v419_v48 = vadd.f32 %v418_v38, %v415_v30  ;;  %v426_v59 = vrot.slane %v425_v52, 2 }
  0x29   : > { %v365_v21 = vmul.f32 1.442695, %v362_v18  ;;  %v367_v22 = vmul.f32 1.442695, %v363_v19  ;;  %v431_v57 = vadd.f32 %v430_v31, %v417_v43  ;;  %v445_v18 = vunpack.c.0.s8 %v444_v4 }
  0x2a   : > { %v851_v20 = vmax.f32 %v359_v16, %v360_v17  ;;  %v420_v56 = vrot.slane %v419_v48, 2  ;;  %v427_v62 = vadd.f32 %v426_v59, %v425_v52 }
  0x2b   : > { %689 = vpow2.f32 %v365_v21  ;;  %v432_v61 = vrot.slane %v431_v57, 2  ;;  %v448_v27 = vsub.s32 %v445_v18, %v770_v1 }
  0x2c   : > { %v364_v23 = vsub.f32 %v343_v50, %v851_v20  ;;  %691 = vpow2.f32 %v367_v22  ;;  %v421_v60 = vadd.f32 %v420_v56, %v419_v48  ;;  %v428_v2 = vrot.slane %v427_v62, 1 }
  0x2d   : > { %v433_v0 = vadd.f32 %v432_v61, %v431_v57 }
  0x2e   : > { %v369_v24 = vmul.f32 1.442695, %v364_v23  ;;  %v422_v63 = vrot.slane %v421_v60, 1  ;;  %v429_v17 = vadd.f32 %v428_v2, %v427_v62 }
  0x2f   : > { %v434_v13 = vrot.slane %v433_v0, 1 }
  0x30   : > { %693 = vpow2.f32 %v369_v24  ;;  %v423_v12 = vadd.f32 %v422_v63, %v421_v60 }
  0x31   : > { %v435_v24 = vadd.f32 %v434_v13, %v433_v0 }
  0x35   : > { %v690_v28 = vpop.eup %689 }
  0x36   : > { %v692_v29 = vpop.eup %691  ;;  %v371_v33 = vrot.slane %v690_v28, 4 }
  0x37   : > { %v377_v35 = vrot.slane %v692_v29, 4 }
  0x38   : > { %v372_v36 = vadd.f32 %v690_v28, %v371_v33 }
  0x39   : > { %v378_v39 = vadd.f32 %v692_v29, %v377_v35 }
  0x3a   : > { %v694_v37 = vpop.eup %693  ;;  %v373_v41 = vrot.slane %v372_v36, 2 }
  0x3b   : > { %v383_v42 = vrot.slane %v694_v37, 4  ;;  %v379_v44 = vrot.slane %v378_v39, 2 }
  0x3c   : > { %v374_v45 = vadd.f32 %v373_v41, %v372_v36 }
  0x3d   : > { %v384_v46 = vadd.f32 %v694_v37, %v383_v42  ;;  %v380_v47 = vadd.f32 %v379_v44, %v378_v39 }
  0x3e   : > { %v375_v49 = vrot.slane %v374_v45, 1 }
  0x3f   : > { %v385_v51 = vrot.slane %v384_v46, 2  ;;  %v381_v53 = vrot.slane %v380_v47, 1 }
  0x40   : > { %v376_v32 = vadd.f32 %v375_v49, %v374_v45 }
  0x41   : > { %v386_v54 = vadd.f32 %v385_v51, %v384_v46  ;;  %v382_v55 = vadd.f32 %v381_v53, %v380_v47 }
  0x42   : > { %695 = vlog2.f32 %v376_v32 }
  0x43   : > { %v387_v58 = vrot.slane %v386_v54, 1  ;;  %697 = vlog2.f32 %v382_v55 }
  0x45   : > { %v388_v50 = vadd.f32 %v387_v58, %v386_v54 }
  0x47   : > { %699 = vlog2.f32 %v388_v50 }
  0x4c   : > { %v696_v6 = vpop.eup %695 }
  0x4d   : > { %v698_v7 = vpop.eup %697  ;;  %v390_v8 = vmul.f32 0.6931472, %v696_v6 }
  0x4e   : > { %v392_v16 = vmul.f32 0.6931472, %v698_v7 }
  0x4f   : > { %v395_v19 = vadd.f32 %v390_v8, %v843_v14 }
  0x50   : > { %v396_v22 = vadd.f32 %v392_v16, %v845_v15 }
  0x51   : > { %v700_v21 = vpop.eup %699  ;;  %v436_v25 = vsub.f32 %v395_v19, %v423_v12 }
  0x52   : > { %v394_v23 = vmul.f32 0.6931472, %v700_v21  ;;  %v437_v26 = vsub.f32 %v396_v22, %v429_v17 }
  0x54   : > { %v397_v28 = vadd.f32 %v394_v23, %v851_v20  ;;  %v442_v29 = vcombine.low %v436_v25, %v437_v26 }
  0x56   : > { %v438_v30 = vsub.f32 %v397_v28, %v435_v24  ;;  %v449_v33 = vrot.slane %v442_v29, %v448_v27 }
  0x58   : > { %v456_v34 = vrot.slane %v438_v30, %v448_v27 }
  0x5a   : > { %v457_v35 = vcombine.low %v449_v33, %v456_v34 }
  0x5c   : > { %v464_v36 = vrot.slane %v457_v35, %v448_v27 }
  0x5e   : > { %v466_v14 = vsel %vm273_vm12, %v464_v36, 0.0 }
  0x5f   : > { %v471_v37 = vrot.slane %v466_v14, %v782_v9  ;;  %v475_v15 = vrot.slane %v466_v14, %v785_v10  ;;  %v479_v38 = vrot.slane %v466_v14, %v788_v11 }
  0x61   : > { %v484_v39 = vsel %vm483_vm8, %v471_v37, 0.0  ;;  %v485_v40 = vsel %vm483_vm8, %v475_v15, 0.0  ;;  %v487_v20 = vsel %vm483_vm8, %v479_v38, 0.0 }
  0x62   : > { %v486_v41 = vadd.f32 %v485_v40, %v484_v39 }
  0x64   : > { %v488_v42 = vadd.f32 %v487_v20, %v486_v41 }
  0x66   : > { %489 = vadd.xlane.f32.xlu0 %v488_v42 }
  0xb0   : > { %v333_v43 = vpop.xlane.xlu0 %332 }
  0xb1   : > { %v334_v44 = vrot.slane %v333_v43, 4 }
  0xb2   : > { %v521_v10 = vpop.xlane.xlu1 %520 }
  0xb3   : > { %v335_v5 = vadd.f32 %v334_v44, %v333_v43  ;;  %v522_v48 = vrot.slane %v521_v10, 4 }
  0xb5   : > { %v336_v45 = vrot.slane %v335_v5, 2  ;;  %v523_v11 = vadd.f32 %v522_v48, %v521_v10 }
  0xb7   : > { %v337_v46 = vadd.f32 %v336_v45, %v335_v5  ;;  %v524_v31 = vrot.slane %v523_v11, 2 }
  0xb9   : > { %v338_v47 = vrot.slane %v337_v46, 1  ;;  %v525_v53 = vadd.f32 %v524_v31, %v523_v11 }
  0xbb   : > { %v339_v9 = vadd.f32 %v338_v47, %v337_v46  ;;  %v526_v55 = vrot.slane %v525_v53, 1 }
  0xbd   : > { %656 = vpush %v339_v9  ;;  %v527_v58 = vadd.f32 %v526_v55, %v525_v53 }
  0xee   : > { %s657_s27 = spop %656 }
  0xef   : > { %v536_v61 = vstv %s657_s27 }
  0xf3   : > { %v490_v49 = vpop.xlane.xlu0 %489 }
  0xf4   : > { %v491_v51 = vrot.slane %v490_v49, 4 }
  0xf6   : > { %v492_v52 = vadd.f32 %v491_v51, %v490_v49 }
  0xf8   : > { %v493_v32 = vrot.slane %v492_v52, 2 }
  0xfa   : > { %v494_v54 = vadd.f32 %v493_v32, %v492_v52 }
  0xfc   : > { %v495_v56 = vrot.slane %v494_v54, 1 }
  0xfe   : > { %v496_v57 = vadd.f32 %v495_v56, %v494_v54 }
 0x100   : > { %658 = vpush %v496_v57 }
 0x101   : > { %660 = vpush %v527_v58 }
 0x131   : > { %s659_s28 = spop %658 }
 0x132   : > { %v534_v59 = vstv %s659_s28  ;;  %s661_s29 = spop %660 }
 0x133   : > { %v532_v50 = vstv %s661_s29 }
 0x134   : > { %v533_v60 = vsel %vm531_vm13, %v532_v50, 0.0 }
 0x135   : > { %v535_v62 = vsel %vm530_vm14, %v534_v59, %v533_v60 }
 0x136   : > { %v537_v63 = vsel %vm529_vm15, %v536_v61, %v535_v62 }
 0x137   : > { %540 = vst [vmem:[%s265_s6] sm:$0xff] %v537_v63 }
 0x138 PF: > { %s13_s14 = sadd.s32 1, %s723_s14   ;;  %s904_s12 = smov %s719_s13 }
 0x139   : > { %p10_p5 = scmp.ge.s32.totalorder %s13_s14, 4   ;;  %s905_s13 = smov %s907_s15 }
 0x13b   :  { %12 = sbr.rel (!%p10_p5) target bundleno = 2 (0x2), region = 72 }

</bundles_post_ra>
